<compile_context>
chip_gen: v5e
topology: v5e:2x2
jax: 0.10.0
libtpu: 0.0.40
codegen_flags: <defaults>
</compile_context>

<pallas_src>
import functools

import jax
import jax.numpy as jnp
from jax.experimental import pallas as pl
from jax.experimental.pallas import tpu as pltpu

_DMA_DEPTH = 4  # outstanding HBM->HBM DMAs kept in flight (power of two)


def _permute_dma_kernel(perm_ref, x_ref, o_ref, sems, *, C, P, total, depth):
    """One grid step == one (batch, output-channel) plane copied HBM->HBM.

    perm_ref : (P,) int32 in SMEM (scalar prefetch)
    x_ref    : (N*C, Hp, Wp) raw HBM ref (memory_space=pl.ANY)
    o_ref    : (N*P, Hp, Wp) raw HBM ref (memory_space=pl.ANY)
    sems     : (depth,) DMA semaphores, rotated round-robin
    """
    n = pl.program_id(0)
    c = pl.program_id(1)
    t = n * P + c                    # flat step index == destination plane row
    slot = t & (depth - 1)

    src_row = n * C + perm_ref[c]    # data-dependent channel gather

    # Free this semaphore slot: drain the DMA issued `depth` steps earlier
    # (same-shaped dummy descriptor is enough to wait on the semaphore).
    @pl.when(t >= depth)
    def _():
        pltpu.make_async_copy(
            x_ref.at[pl.ds(0, 1)], o_ref.at[pl.ds(0, 1)], sems.at[slot]
        ).wait()

    # Issue this step's plane copy; only the leading (non-tiled) dim is
    # sliced, so the DMA moves a whole contiguous tiled plane.
    pltpu.make_async_copy(
        x_ref.at[pl.ds(src_row, 1)], o_ref.at[pl.ds(t, 1)], sems.at[slot]
    ).start()

    # Final grid step: drain every DMA still in flight before the kernel ends.
    @pl.when(t == total - 1)
    def _():
        for d in range(min(depth, total)):
            s = (total - 1 - d) % depth
            pltpu.make_async_copy(
                x_ref.at[pl.ds(0, 1)], o_ref.at[pl.ds(0, 1)], sems.at[s]
            ).wait()


def permute(x, permutation=(2, 1, 0)):
    """x: (N, C, H, W). Returns x[:, permutation] with shape (N, len(perm), H, W)."""
    N, C, H, W = x.shape
    perm = jnp.asarray(permutation, dtype=jnp.int32)
    P = int(perm.shape[0])
    HW = H * W
    total = N * P
    assert _DMA_DEPTH & (_DMA_DEPTH - 1) == 0, "DMA depth must be a power of two"

    # Lane-dense spatial layout: when H*W is a multiple of 128, re-factor each
    # plane to (HW//128, 128) so the copied HBM block carries no lane padding.
    # Pure layout plumbing (free reshapes) -- the DMA moves whole planes.
    if HW % 128 == 0:
        Hp, Wp = HW // 128, 128
    else:
        Hp, Wp = H, W
    x_planes = x.reshape(N * C, Hp, Wp)

    kernel = functools.partial(
        _permute_dma_kernel, C=C, P=P, total=total, depth=_DMA_DEPTH
    )

    grid_spec = pltpu.PrefetchScalarGridSpec(
        num_scalar_prefetch=1,
        grid=(N, P),
        in_specs=[pl.BlockSpec(memory_space=pl.ANY)],   # raw HBM, no auto-DMA
        out_specs=pl.BlockSpec(memory_space=pl.ANY),    # written via DMA only
        scratch_shapes=[pltpu.SemaphoreType.DMA((_DMA_DEPTH,))],
    )

    out_planes = pl.pallas_call(
        kernel,
        out_shape=jax.ShapeDtypeStruct((N * P, Hp, Wp), x.dtype),
        grid_spec=grid_spec,
        compiler_params=pltpu.CompilerParams(
            # DMA slots carry across grid steps -> sequential ("arbitrary").
            # A single TensorCore only issues descriptors; the DMA engines
            # saturate HBM, so v7x's second core buys nothing here.
            dimension_semantics=("arbitrary", "arbitrary"),
        ),
    )(perm, x_planes)

    return out_planes.reshape(N, P, H, W)


if __name__ == "__main__":
    key = jax.random.PRNGKey(0)
    permutation = [2, 1, 0]

    # Test 1: H*W multiple of 128 (lane-dense plane path).
    x1 = jax.random.normal(key, (2, 3, 16, 16), dtype=jnp.float32)
    out1 = jax.block_until_ready(permute(x1, permutation))
    ref1 = x1[:, jnp.asarray(permutation)]
    assert out1.shape == ref1.shape, (out1.shape, ref1.shape)
    assert out1.dtype == ref1.dtype, (out1.dtype, ref1.dtype)
    assert jnp.array_equal(out1, ref1), "mismatch vs reference (test 1)"

    # Test 2: H*W not a multiple of 128 (raw (H, W) plane path).
    x2 = jax.random.normal(jax.random.PRNGKey(1), (2, 3, 20, 28), dtype=jnp.float32)
    out2 = jax.block_until_ready(permute(x2, permutation))
    ref2 = x2[:, jnp.asarray(permutation)]
    assert out2.shape == ref2.shape, (out2.shape, ref2.shape)
    assert out2.dtype == ref2.dtype, (out2.dtype, ref2.dtype)
    assert jnp.array_equal(out2, ref2), "mismatch vs reference (test 2)"

    print("KERNEL_OK")
</pallas_src>

<mosaic_0001>
module attributes {stable_mosaic.version = 11 : i64} {
  func.func @_permute_dma_kernel(%arg0: i32, %arg1: i32, %arg2: memref<3xi32, #tpu.memory_space<smem>>, %arg3: memref<6x2x128xf32, #tpu.memory_space<any>>, %arg4: memref<6x2x128xf32, #tpu.memory_space<any>>, %arg5: memref<4x!tpu.dma_semaphore, #tpu.memory_space<semaphore_mem>>) attributes {dimension_semantics = [#tpu.dimension_semantics<arbitrary>, #tpu.dimension_semantics<arbitrary>], iteration_bounds = array<i64: 2, 3>, scalar_prefetch = 1 : i64, scratch_operands = 1 : i64, tpu.core_type = #tpu.core_type<tc>, window_params = [{}, {}]} {
    %c3_i32 = arith.constant 3 : i32
    %0 = arith.muli %arg0, %c3_i32 : i32
    %1 = arith.addi %0, %arg1 : i32
    %c3_i32_0 = arith.constant 3 : i32
    %2 = arith.andi %1, %c3_i32_0 : i32
    %c3_i32_1 = arith.constant 3 : i32
    %3 = arith.muli %arg0, %c3_i32_1 : i32
    %4 = arith.index_cast %arg1 : i32 to index
    %5 = memref.load %arg2[%4] : memref<3xi32, #tpu.memory_space<smem>>
    %6 = arith.addi %3, %5 : i32
    %c4_i32 = arith.constant 4 : i32
    %7 = arith.cmpi sge, %1, %c4_i32 : i32
    %8 = arith.extui %7 : i1 to i32
    %c0_i32 = arith.constant 0 : i32
    %9 = arith.cmpi ne, %8, %c0_i32 : i32
    scf.if %9 {
      %c0_i32_7 = arith.constant 0 : i32
      %c0_i32_8 = arith.constant 0 : i32
      %c0_i32_9 = arith.constant 0 : i32
      %17 = tpu.memref_slice %arg3[%c0_i32_7, %c0_i32_8, %c0_i32_9] : memref<6x2x128xf32, #tpu.memory_space<any>> -> memref<1x2x128xf32, #tpu.memory_space<any>>
      %c0_i32_10 = arith.constant 0 : i32
      %c0_i32_11 = arith.constant 0 : i32
      %c0_i32_12 = arith.constant 0 : i32
      %18 = tpu.memref_slice %arg4[%c0_i32_10, %c0_i32_11, %c0_i32_12] : memref<6x2x128xf32, #tpu.memory_space<any>> -> memref<1x2x128xf32, #tpu.memory_space<any>>
      %19 = tpu.memref_slice %arg5[%2] : memref<4x!tpu.dma_semaphore, #tpu.memory_space<semaphore_mem>> -> memref<1x!tpu.dma_semaphore, #tpu.memory_space<semaphore_mem>>
      %20 = tpu.memref_squeeze %19 : memref<1x!tpu.dma_semaphore, #tpu.memory_space<semaphore_mem>> -> memref<!tpu.dma_semaphore, #tpu.memory_space<semaphore_mem>>
      tpu.wait_dma2 semaphore(%20 : memref<!tpu.dma_semaphore, #tpu.memory_space<semaphore_mem>>) src(%17 : memref<1x2x128xf32, #tpu.memory_space<any>>) dst(%18 : memref<1x2x128xf32, #tpu.memory_space<any>>)
    } else {
    }
    %c0_i32_2 = arith.constant 0 : i32
    %c0_i32_3 = arith.constant 0 : i32
    %10 = tpu.memref_slice %arg3[%6, %c0_i32_2, %c0_i32_3] : memref<6x2x128xf32, #tpu.memory_space<any>> -> memref<1x2x128xf32, #tpu.memory_space<any>>
    %c0_i32_4 = arith.constant 0 : i32
    %c0_i32_5 = arith.constant 0 : i32
    %11 = tpu.memref_slice %arg4[%1, %c0_i32_4, %c0_i32_5] : memref<6x2x128xf32, #tpu.memory_space<any>> -> memref<1x2x128xf32, #tpu.memory_space<any>>
    %12 = tpu.memref_slice %arg5[%2] : memref<4x!tpu.dma_semaphore, #tpu.memory_space<semaphore_mem>> -> memref<1x!tpu.dma_semaphore, #tpu.memory_space<semaphore_mem>>
    %13 = tpu.memref_squeeze %12 : memref<1x!tpu.dma_semaphore, #tpu.memory_space<semaphore_mem>> -> memref<!tpu.dma_semaphore, #tpu.memory_space<semaphore_mem>>
    tpu.enqueue_dma source(%10 : memref<1x2x128xf32, #tpu.memory_space<any>>) target(%11 : memref<1x2x128xf32, #tpu.memory_space<any>>) target_semaphore(%13 : memref<!tpu.dma_semaphore, #tpu.memory_space<semaphore_mem>>)
    %c5_i32 = arith.constant 5 : i32
    %14 = arith.cmpi eq, %1, %c5_i32 : i32
    %15 = arith.extui %14 : i1 to i32
    %c0_i32_6 = arith.constant 0 : i32
    %16 = arith.cmpi ne, %15, %c0_i32_6 : i32
    scf.if %16 {
      %c1_i32 = arith.constant 1 : i32
      %c0_i32_7 = arith.constant 0 : i32
      %c0_i32_8 = arith.constant 0 : i32
      %c0_i32_9 = arith.constant 0 : i32
      %17 = tpu.memref_slice %arg3[%c0_i32_7, %c0_i32_8, %c0_i32_9] : memref<6x2x128xf32, #tpu.memory_space<any>> -> memref<1x2x128xf32, #tpu.memory_space<any>>
      %c0_i32_10 = arith.constant 0 : i32
      %c0_i32_11 = arith.constant 0 : i32
      %c0_i32_12 = arith.constant 0 : i32
      %18 = tpu.memref_slice %arg4[%c0_i32_10, %c0_i32_11, %c0_i32_12] : memref<6x2x128xf32, #tpu.memory_space<any>> -> memref<1x2x128xf32, #tpu.memory_space<any>>
      %19 = tpu.memref_slice %arg5[%c1_i32] : memref<4x!tpu.dma_semaphore, #tpu.memory_space<semaphore_mem>> -> memref<1x!tpu.dma_semaphore, #tpu.memory_space<semaphore_mem>>
      %20 = tpu.memref_squeeze %19 : memref<1x!tpu.dma_semaphore, #tpu.memory_space<semaphore_mem>> -> memref<!tpu.dma_semaphore, #tpu.memory_space<semaphore_mem>>
      tpu.wait_dma2 semaphore(%20 : memref<!tpu.dma_semaphore, #tpu.memory_space<semaphore_mem>>) src(%17 : memref<1x2x128xf32, #tpu.memory_space<any>>) dst(%18 : memref<1x2x128xf32, #tpu.memory_space<any>>)
      %c0_i32_13 = arith.constant 0 : i32
      %c0_i32_14 = arith.constant 0 : i32
      %c0_i32_15 = arith.constant 0 : i32
      %c0_i32_16 = arith.constant 0 : i32
      %21 = tpu.memref_slice %arg3[%c0_i32_14, %c0_i32_15, %c0_i32_16] : memref<6x2x128xf32, #tpu.memory_space<any>> -> memref<1x2x128xf32, #tpu.memory_space<any>>
      %c0_i32_17 = arith.constant 0 : i32
      %c0_i32_18 = arith.constant 0 : i32
      %c0_i32_19 = arith.constant 0 : i32
      %22 = tpu.memref_slice %arg4[%c0_i32_17, %c0_i32_18, %c0_i32_19] : memref<6x2x128xf32, #tpu.memory_space<any>> -> memref<1x2x128xf32, #tpu.memory_space<any>>
      %23 = tpu.memref_slice %arg5[%c0_i32_13] : memref<4x!tpu.dma_semaphore, #tpu.memory_space<semaphore_mem>> -> memref<1x!tpu.dma_semaphore, #tpu.memory_space<semaphore_mem>>
      %24 = tpu.memref_squeeze %23 : memref<1x!tpu.dma_semaphore, #tpu.memory_space<semaphore_mem>> -> memref<!tpu.dma_semaphore, #tpu.memory_space<semaphore_mem>>
      tpu.wait_dma2 semaphore(%24 : memref<!tpu.dma_semaphore, #tpu.memory_space<semaphore_mem>>) src(%21 : memref<1x2x128xf32, #tpu.memory_space<any>>) dst(%22 : memref<1x2x128xf32, #tpu.memory_space<any>>)
      %c3_i32_20 = arith.constant 3 : i32
      %c0_i32_21 = arith.constant 0 : i32
      %c0_i32_22 = arith.constant 0 : i32
      %c0_i32_23 = arith.constant 0 : i32
      %25 = tpu.memref_slice %arg3[%c0_i32_21, %c0_i32_22, %c0_i32_23] : memref<6x2x128xf32, #tpu.memory_space<any>> -> memref<1x2x128xf32, #tpu.memory_space<any>>
      %c0_i32_24 = arith.constant 0 : i32
      %c0_i32_25 = arith.constant 0 : i32
      %c0_i32_26 = arith.constant 0 : i32
      %26 = tpu.memref_slice %arg4[%c0_i32_24, %c0_i32_25, %c0_i32_26] : memref<6x2x128xf32, #tpu.memory_space<any>> -> memref<1x2x128xf32, #tpu.memory_space<any>>
      %27 = tpu.memref_slice %arg5[%c3_i32_20] : memref<4x!tpu.dma_semaphore, #tpu.memory_space<semaphore_mem>> -> memref<1x!tpu.dma_semaphore, #tpu.memory_space<semaphore_mem>>
      %28 = tpu.memref_squeeze %27 : memref<1x!tpu.dma_semaphore, #tpu.memory_space<semaphore_mem>> -> memref<!tpu.dma_semaphore, #tpu.memory_space<semaphore_mem>>
      tpu.wait_dma2 semaphore(%28 : memref<!tpu.dma_semaphore, #tpu.memory_space<semaphore_mem>>) src(%25 : memref<1x2x128xf32, #tpu.memory_space<any>>) dst(%26 : memref<1x2x128xf32, #tpu.memory_space<any>>)
      %c2_i32 = arith.constant 2 : i32
      %c0_i32_27 = arith.constant 0 : i32
      %c0_i32_28 = arith.constant 0 : i32
      %c0_i32_29 = arith.constant 0 : i32
      %29 = tpu.memref_slice %arg3[%c0_i32_27, %c0_i32_28, %c0_i32_29] : memref<6x2x128xf32, #tpu.memory_space<any>> -> memref<1x2x128xf32, #tpu.memory_space<any>>
      %c0_i32_30 = arith.constant 0 : i32
      %c0_i32_31 = arith.constant 0 : i32
      %c0_i32_32 = arith.constant 0 : i32
      %30 = tpu.memref_slice %arg4[%c0_i32_30, %c0_i32_31, %c0_i32_32] : memref<6x2x128xf32, #tpu.memory_space<any>> -> memref<1x2x128xf32, #tpu.memory_space<any>>
      %31 = tpu.memref_slice %arg5[%c2_i32] : memref<4x!tpu.dma_semaphore, #tpu.memory_space<semaphore_mem>> -> memref<1x!tpu.dma_semaphore, #tpu.memory_space<semaphore_mem>>
      %32 = tpu.memref_squeeze %31 : memref<1x!tpu.dma_semaphore, #tpu.memory_space<semaphore_mem>> -> memref<!tpu.dma_semaphore, #tpu.memory_space<semaphore_mem>>
      tpu.wait_dma2 semaphore(%32 : memref<!tpu.dma_semaphore, #tpu.memory_space<semaphore_mem>>) src(%29 : memref<1x2x128xf32, #tpu.memory_space<any>>) dst(%30 : memref<1x2x128xf32, #tpu.memory_space<any>>)
    } else {
    }
    return
  }
}

</mosaic_0001>

<bundles_post_ra>
// kernel: tpu_custom_call.1
= control target key start
LH: loop header
LB: loop body
LE: loop exit
PB: predicated region body
PF: predicated region fallthrough
CT: control target
= control target key end

     0   :  { %s227_s12 = smov [#allocation4]   ;;  %s275_s0 = inlined_call_operand.hbm [shape: s32[3], index: 0, kind: input, shape index: {}]   ;;  %s276_s1 = inlined_call_operand.hbm [shape: f32[6,2,128], index: 1, kind: input, shape index: {}]   ;;  %s277_s2 = inlined_call_operand.hbm [shape: f32[6,2,128], index: 2, kind: output, shape index: {}]  }
   0x1   :  { %s8_s11 = sshll.u32 %s275_s0, 4  ;;  %s9_s11 = int_to_ptr.hbm [resolvable:$true] %s8_s11 }
   0x2   :  { %11 = dma.hbm_to_smem %s9_s11, 16, %s227_s12, [#allocation3] }
   0x3   :  { %193 = dma.done.wait [#allocation3], 16 }
   0x4   :  { %194 = vsyncadd [#allocation3], 4294967280 }
   0x5   :  { %14 = sfence }
   0x6   :  { %s248_s13 = smov 0   ;;  %s250_s14 = smov 0  }
   0x7   :  { %s252_s15 = smov 0  }
   0x8 LB: > { %s23_s0 = sadd.s32 1, %s217_s13  ;;  %s26_s16 = sadd.s32 1, %s221_s14  ;;  %s225_s15 = sphi %s252_s15, %s20_s15   ;;  %s221_s14 = sphi %s250_s14, %s279_s14   ;;  %s217_s13 = sphi %s248_s13, %s278_s13  }
   0x9   : > { %p24_p0 = scmp.ge.s32.totalorder %s23_s0, 3  ;;  %s30_s17 = smul.u32 3, %s221_s14 }
   0xa   : > { %s33_s18 = sld [smem:[#allocation4 + %s217_s13]] }
   0xb   : > { %s281_s0 = smov (%p24_p0, %s23_s0), 0  ;;  %s283_s16 = smov (!%p24_p0, %s26_s16), %s221_s14 }
   0xc   : > { %s31_s19 = sadd.s32 %s217_s13, %s30_s17  ;;  %p28_p1 = scmp.ge.s32.totalorder %s283_s16, 2 }
   0xd   : > { %s32_s20 = sand.u32 3, %s31_s19  ;;  %p140_p2 = scmp.ge.s32.totalorder %s31_s19, 4 }
   0xe   : > { %s285_s16 = smov (%p28_p1, %s283_s16), 0  ;;  %s39_s22 = scalar_lea.sflag [#allocation2], %s32_s20 }
  0x10   : > { %s34_s21 = sadd.s32 %s33_s18, %s30_s17 }
  0x11   : > { %196 = dma.done.wait (%p140_p2), %s39_s22, 32 }
  0x12   : > { %198 = vsyncadd (%p140_p2), %s39_s22, 4294967264  ;;  %s126_s23 = sshll.u32 %s34_s21, 1  ;;  %s127_s24 = sshll.u32 %s31_s19, 1 }
  0x13   : > { %s45_s27 = scalar_lea.hbm %s276_s1, %s126_s23  ;;  %s47_s30 = scalar_lea.hbm %s277_s2, %s127_s24 }
  0x14   : > { %s53_s3 = sshll.u32 %s45_s27, 4  ;;  %s55_s4 = sshll.u32 %s47_s30, 4  ;;  %s54_s3 = int_to_ptr.hbm [resolvable:$true] %s53_s3  ;;  %s56_s4 = int_to_ptr.hbm [resolvable:$true] %s55_s4 }
  0x15   : > { %s228_s5 = smov [#allocation5]   ;;  %s229_s6 = smov 0  }
  0x16   : > { %59 = dma.general %s54_s3, 32, %s56_s4, %s39_s22, %s228_s5, [#allocation6], %s229_s6, 0  }
  0x17   : > { %p141_p3 = scmp.eq.s32.totalorder %s31_s19, 5 }
  0x19   : > { %200 = dma.done.wait (%p141_p3), [#allocation2 + $0x1], 32 }
  0x1a   : > { %202 = vsyncadd (%p141_p3), [#allocation2 + $0x1], 4294967264 }
  0x1b   : > { %204 = dma.done.wait (%p141_p3), [#allocation2], 32 }
  0x1c   : > { %206 = vsyncadd (%p141_p3), [#allocation2], 4294967264 }
  0x1d   : > { %208 = dma.done.wait (%p141_p3), [#allocation2 + $0x3], 32 }
  0x1e   : > { %210 = vsyncadd (%p141_p3), [#allocation2 + $0x3], 4294967264 }
  0x1f   : > { %212 = dma.done.wait (%p141_p3), [#allocation2 + $0x2], 32 }
  0x20   : > { %214 = vsyncadd (%p141_p3), [#allocation2 + $0x2], 4294967264  ;;  %s20_s15 = sadd.s32 1, %s225_s15   ;;  %s278_s13 = smov %s281_s0 }
  0x21   : > { %p17_p4 = scmp.ge.s32.totalorder %s20_s15, 6   ;;  %s279_s14 = smov %s285_s16 }
  0x23   :  { %19 = sbr.rel (!%p17_p4) target bundleno = 8 (0x8), region = 37 }
  0x28   :  { %77 = vsyncmov [#allocation2] }
  0x2b   :  { %s78_s7 = vpop.sfrf %77 }
  0x2c   :  { %p129_p5 = scmp.ne.s32.totalorder %s78_s7, 0 }
  0x2e   :  { %82 = shalt.err (%p129_p5)  }
  0x2f   :  { %84 = vsyncmov [#allocation2 + $0x1] }
  0x32   :  { %s85_s8 = vpop.sfrf %84 }
  0x33   :  { %p130_p6 = scmp.ne.s32.totalorder %s85_s8, 0 }
  0x35   :  { %89 = shalt.err (%p130_p6)  }
  0x36   :  { %91 = vsyncmov [#allocation2 + $0x2] }
  0x39   :  { %s92_s9 = vpop.sfrf %91 }
  0x3a   :  { %p131_p7 = scmp.ne.s32.totalorder %s92_s9, 0 }
  0x3c   :  { %96 = shalt.err (%p131_p7)  }
  0x3d   :  { %98 = vsyncmov [#allocation2 + $0x3] }
  0x40   :  { %s99_s10 = vpop.sfrf %98 }
  0x41   :  { %p132_p8 = scmp.ne.s32.totalorder %s99_s10, 0 }
  0x43   :  { %103 = shalt.err (%p132_p8)  }

</bundles_post_ra>
